<compile_context>
chip_gen: v6e
topology: v6e:2x2x1
jax: 0.10.0
libtpu: 0.0.40
codegen_flags: <defaults>
</compile_context>

<pallas_src>
import functools

import jax
import jax.numpy as jnp
from jax.experimental import pallas as pl
from jax.experimental.pallas import tpu as pltpu


def _round_up(x: int, m: int) -> int:
    return ((x + m - 1) // m) * m


def _gelu_exact(x):
    # nn.GELU() default: 0.5 * x * (1 + erf(x / sqrt(2)))
    return 0.5 * x * (1.0 + jax.lax.erf(x * 0.7071067811865476))


def _gelu_tanh(x):
    # Cheaper path (tanh/exp go to the EUP slot). Optional; not the default,
    # to match nn.GELU() exactly.
    return jax.nn.gelu(x, approximate=True)


def mlp_kernel(x_ref, w1_ref, b1_ref, w2_ref, b2_ref, o_ref, *scratch,
               approximate_gelu: bool, single_k: bool):
    # (tm, H) @ (H, ti) -> (tm, ti), f32 accumulation on the MXU.
    h = jnp.dot(x_ref[...], w1_ref[...], preferred_element_type=jnp.float32)
    h = h + b1_ref[...]                                   # (1, ti) broadcast, f32
    h = _gelu_tanh(h) if approximate_gelu else _gelu_exact(h)
    # (tm, ti) @ (ti, H) -> (tm, H), f32 partial product.
    p = jnp.dot(h.astype(w2_ref.dtype), w2_ref[...],
                preferred_element_type=jnp.float32)

    if single_k:
        # Resident-weight path: whole intermediate dim in one step.
        o_ref[...] = (p + b2_ref[...]).astype(o_ref.dtype)
        return

    k = pl.program_id(1)
    last = pl.num_programs(1) - 1

    if scratch:
        # Non-f32 output: accumulate in an f32 VMEM scratch, write back once.
        acc_ref = scratch[0]

        @pl.when(k == 0)
        def _init():
            acc_ref[...] = jnp.zeros_like(acc_ref)

        acc_ref[...] += p

        @pl.when(k == last)
        def _finalize():
            o_ref[...] = (acc_ref[...] + b2_ref[...]).astype(o_ref.dtype)
    else:
        # f32 output: the output block index is k-invariant, so accumulate
        # directly into the VMEM-resident output (saves scratch + final copy).
        @pl.when(k == 0)
        def _init():
            o_ref[...] = jnp.zeros_like(o_ref)

        o_ref[...] += p

        @pl.when(k == last)
        def _finalize():
            o_ref[...] = o_ref[...] + b2_ref[...]


def _vmem_bytes(tm, ti, H, bw, out_sz, use_scratch):
    """Rough per-call VMEM footprint for a (tm, ti) tile choice (double-buffered)."""
    b = 2 * tm * H * bw          # x tile
    b += 2 * H * ti * bw         # W1 block
    b += 2 * ti * H * bw         # W2 block
    b += 2 * 8 * ti * 4          # b1 (sublane-padded, f32)
    b += 2 * 8 * H * 4           # b2 (sublane-padded, f32)
    b += 2 * tm * H * out_sz     # output tile
    if use_scratch:
        b += tm * H * 4          # f32 accumulator
    return b


def mlp_layer(x, w1, b1, w2, b2, *, tm=None, ti=None,
              compute_dtype=jnp.bfloat16, approximate_gelu=False):
    """x: (..., hidden). Weights stored as (in_features, out_features) == torch weight.T.

    Returns the same shape/dtype as x. Default compute is bf16 on the MXU with
    f32 accumulation and f32 bias/GELU; pass compute_dtype=jnp.float32 for the
    bit-accurate path.
    """
    orig_shape = x.shape
    H = x.shape[-1]
    I = w1.shape[-1]
    assert w1.shape == (H, I) and w2.shape == (I, H)
    assert b1.shape == (I,) and b2.shape == (H,)

    x2 = x.reshape(-1, H)
    M = x2.shape[0]

    out_dtype = x.dtype
    bw = jnp.dtype(compute_dtype).itemsize
    out_sz = jnp.dtype(out_dtype).itemsize

    # ---- generation-aware VMEM budget ------------------------------------
    vmem_cap = 128 * 1024 * 1024
    try:
        info = pltpu.get_tpu_info()
        for attr in ("vmem_capacity_bytes", "vmem_bytes", "vmem_size_bytes"):
            v = getattr(info, attr, None)
            if v:
                vmem_cap = int(v)
                break
    except Exception:
        pass
    # ~96 MiB on 128 MiB parts (v5e/v6e), ~48 MiB on v7x's 64 MiB.
    budget = int(min(vmem_cap * 0.75, 100 * 1024 * 1024))

    # ---- row tile (sublane axis, multiple of 8) ---------------------------
    M8 = _round_up(max(M, 1), 8)
    tm_eff = min(512 if tm is None else _round_up(tm, 8), M8)
    tm_eff = max(8, tm_eff)

    # ---- intermediate tile: prefer resident weights -----------------------
    if ti is not None:
        ti_eff = I if ti >= I else _round_up(min(_round_up(ti, 128), I), 128)
        if ti_eff >= I:
            ti_eff = I
    else:
        t = tm_eff
        while _vmem_bytes(t, I, H, bw, out_sz, False) > budget and t > 128:
            t = max(128, _round_up(t // 2, 8))
        if _vmem_bytes(t, I, H, bw, out_sz, False) <= budget or I <= 128:
            # Weights fit: keep them resident (DMA'd once), possibly smaller tm.
            tm_eff = t
            ti_eff = I
        else:
            # Weights too large: stream them along k; keep tm large for intensity.
            align = 256 if I >= 512 else 128
            need_scratch = jnp.dtype(out_dtype) != jnp.dtype(jnp.float32)
            ti_eff = max(align, (min(512, _round_up(I, align)) // align) * align)
            while (_vmem_bytes(tm_eff, ti_eff, H, bw, out_sz, need_scratch) > budget
                   and ti_eff > align):
                ti_eff = max(align, (ti_eff // 2 // align) * align)
            while (_vmem_bytes(tm_eff, ti_eff, H, bw, out_sz, need_scratch) > budget
                   and tm_eff > 64):
                tm_eff = max(64, _round_up(tm_eff // 2, 8))
            if ti_eff >= I:
                ti_eff = I

    Ip = I if ti_eff == I else _round_up(I, ti_eff)
    nk = max(1, Ip // ti_eff)
    single_k = nk == 1
    use_scratch = (not single_k) and (jnp.dtype(out_dtype) != jnp.dtype(jnp.float32))

    # ---- guarantee >= 2 row tiles so both v7x TensorCores get work --------
    Mp = _round_up(M, tm_eff)
    if Mp // tm_eff < 2 and M > 8:
        tm_eff = _round_up((M + 1) // 2, 8)
        Mp = 2 * tm_eff

    # ---- zero padding (padded W2 rows are zero -> contribute nothing) -----
    if Mp != M:
        x2 = jnp.pad(x2, ((0, Mp - M), (0, 0)))
    w1p, b1p, w2p = w1, b1, w2
    if Ip != I:
        w1p = jnp.pad(w1, ((0, 0), (0, Ip - I)))
        b1p = jnp.pad(b1, ((0, Ip - I),))
        w2p = jnp.pad(w2, ((0, Ip - I), (0, 0)))

    x2c = x2.astype(compute_dtype)
    w1c = w1p.astype(compute_dtype)
    w2c = w2p.astype(compute_dtype)
    b1_2d = b1p.reshape(1, Ip).astype(jnp.float32)   # bias add / GELU stay f32
    b2_2d = b2.reshape(1, H).astype(jnp.float32)

    grid = (Mp // tm_eff, nk)
    n_row_tiles = grid[0]

    # Truthful advisory cost estimate (weights re-streamed per row tile iff tiled).
    weight_bytes = 2 * H * I * bw
    cost = pl.CostEstimate(
        flops=4 * M * H * I,
        transcendentals=M * I,
        bytes_accessed=int(M * H * bw + M * H * out_sz
                           + weight_bytes * (1 if single_k else n_row_tiles)
                           + (Ip + H) * 4),
    )

    # Always set an explicit, generation-aware scoped-VMEM limit.
    tile_bytes = _vmem_bytes(tm_eff, ti_eff, H, bw, out_sz, use_scratch)
    vmem_limit = int(min(max(int(tile_bytes * 1.5), 32 * 1024 * 1024),
                         int(vmem_cap * 0.85)))

    kernel = functools.partial(mlp_kernel,
                               approximate_gelu=approximate_gelu,
                               single_k=single_k)

    scratch_shapes = ([pltpu.VMEM((tm_eff, H), jnp.float32)]
                      if use_scratch else [])

    out = pl.pallas_call(
        kernel,
        out_shape=jax.ShapeDtypeStruct((Mp, H), out_dtype),
        grid_spec=pltpu.PrefetchScalarGridSpec(
            num_scalar_prefetch=0,
            grid=grid,
            in_specs=[
                pl.BlockSpec((tm_eff, H), lambda i, k: (i, 0)),      # x rows
                pl.BlockSpec((H, ti_eff), lambda i, k: (0, k)),      # W1 column block
                pl.BlockSpec((1, ti_eff), lambda i, k: (0, k)),      # b1 block
                pl.BlockSpec((ti_eff, H), lambda i, k: (k, 0)),      # W2 row block
                pl.BlockSpec((1, H), lambda i, k: (0, 0)),           # b2 (invariant)
            ],
            out_specs=pl.BlockSpec((tm_eff, H), lambda i, k: (i, 0)),
            scratch_shapes=scratch_shapes,
        ),
        compiler_params=pltpu.CompilerParams(
            dimension_semantics=("parallel", "arbitrary"),           # rows shard across TCs
            vmem_limit_bytes=vmem_limit,
        ),
        cost_estimate=cost,
    )(x2c, w1c, b1_2d, w2c, b2_2d)

    if Mp != M:
        out = out[:M]
    return out.reshape(orig_shape)


def init_params(key, hidden_dim, intermediate_dim, dtype=jnp.float32):
    """Deterministic init matching nn.Linear's uniform(-1/sqrt(in), 1/sqrt(in))."""
    k1, k2, k3, k4 = jax.random.split(key, 4)
    lim1 = 1.0 / jnp.sqrt(hidden_dim)
    lim2 = 1.0 / jnp.sqrt(intermediate_dim)
    # Stored as (in_features, out_features) == PyTorch weight.T
    w1 = jax.random.uniform(k1, (hidden_dim, intermediate_dim), dtype, -lim1, lim1)
    b1 = jax.random.uniform(k2, (intermediate_dim,), dtype, -lim1, lim1)
    w2 = jax.random.uniform(k3, (intermediate_dim, hidden_dim), dtype, -lim2, lim2)
    b2 = jax.random.uniform(k4, (hidden_dim,), dtype, -lim2, lim2)
    return w1, b1, w2, b2


def ref_mlp(x, w1, b1, w2, b2):
    h = x @ w1 + b1
    h = 0.5 * h * (1.0 + jax.lax.erf(h / jnp.sqrt(2.0)))
    return h @ w2 + b2


if __name__ == "__main__":
    key = jax.random.PRNGKey(0)
    k0, k1, k2, k3 = jax.random.split(key, 4)

    # Case 1: toy config, exact-f32 path (resident weights, single k step,
    # row split into 2 tiles for the megacore/2-TC case).
    H, I = 32, 64
    x = jax.random.normal(k0, (2, 8, H), dtype=jnp.float32)
    w1, b1, w2, b2 = init_params(k1, H, I)
    y = jax.block_until_ready(
        mlp_layer(x, w1, b1, w2, b2, compute_dtype=jnp.float32))
    y_ref = ref_mlp(x, w1, b1, w2, b2)
    assert y.shape == x.shape and y.dtype == x.dtype
    assert jnp.allclose(y, y_ref, atol=1e-5, rtol=1e-5), "f32 toy mismatch"

    # Case 1b: default bf16 MXU path (f32 accumulation), looser tolerance.
    y16 = jax.block_until_ready(mlp_layer(x, w1, b1, w2, b2))
    assert jnp.allclose(y16, y_ref, atol=1e-1, rtol=1e-1), "bf16 toy mismatch"

    # Case 2: lane-aligned config exercising row tiling, row padding
    # (M=120 -> 128) and the streamed-weight k axis with in-place f32
    # output accumulation (grid=(2, 2), no scratch).
    H, I = 128, 256
    x = jax.random.normal(k2, (3, 40, H), dtype=jnp.float32)
    w1, b1, w2, b2 = init_params(k3, H, I)
    y_ref = ref_mlp(x, w1, b1, w2, b2)
    y = jax.block_until_ready(
        mlp_layer(x, w1, b1, w2, b2, tm=64, ti=128, compute_dtype=jnp.float32))
    assert y.shape == x.shape
    assert jnp.allclose(y, y_ref, atol=1e-3, rtol=1e-3), "tiled f32 mismatch"

    # Case 2b: default auto tiling (bf16 compute, resident weights, >=2 row tiles).
    y16 = jax.block_until_ready(mlp_layer(x, w1, b1, w2, b2))
    assert jnp.allclose(y16, y_ref, atol=1e-1, rtol=1e-1), "auto bf16 mismatch"

    # Case 3: bf16 inputs + streamed weights -> f32 scratch-accumulator path.
    xb = x.astype(jnp.bfloat16)
    yb = jax.block_until_ready(mlp_layer(xb, w1, b1, w2, b2, tm=64, ti=128))
    y_ref_b = ref_mlp(xb.astype(jnp.float32), w1, b1, w2, b2)
    assert yb.dtype == jnp.bfloat16
    assert jnp.allclose(yb.astype(jnp.float32), y_ref_b,
                        atol=1.5e-1, rtol=1.5e-1), "bf16 scratch path mismatch"

    print("KERNEL_OK")
</pallas_src>

<mosaic_0001>
module attributes {stable_mosaic.version = 11 : i64} {
  func.func @mlp_kernel(%arg0: i32, %arg1: i32, %arg2: memref<8x32xf32, #tpu.memory_space<vmem>>, %arg3: memref<32x64xf32, #tpu.memory_space<vmem>>, %arg4: memref<1x64xf32, #tpu.memory_space<vmem>>, %arg5: memref<64x32xf32, #tpu.memory_space<vmem>>, %arg6: memref<1x32xf32, #tpu.memory_space<vmem>>, %arg7: memref<8x32xf32, #tpu.memory_space<vmem>>) attributes {dimension_semantics = [#tpu.dimension_semantics<parallel>, #tpu.dimension_semantics<arbitrary>], iteration_bounds = array<i64: 2, 1>, scalar_prefetch = 0 : i64, scratch_operands = 0 : i64, tpu.core_type = #tpu.core_type<tc>, window_params = [{transform_indices = @transform_0, window_bounds = array<i64: 8, 32>}, {transform_indices = @transform_1, window_bounds = array<i64: 32, 64>}, {transform_indices = @transform_2, window_bounds = array<i64: 1, 64>}, {transform_indices = @transform_3, window_bounds = array<i64: 64, 32>}, {pipeline_mode = #tpu.pipeline_mode<synchronous>, transform_indices = @transform_4, window_bounds = array<i64: 1, 32>}, {transform_indices = @transform_5, window_bounds = array<i64: 8, 32>}]} {
    %c0 = arith.constant 0 : index
    %c0_0 = arith.constant 0 : index
    %0 = vector.load %arg2[%c0, %c0_0] : memref<8x32xf32, #tpu.memory_space<vmem>>, vector<8x32xf32>
    %c0_1 = arith.constant 0 : index
    %c0_2 = arith.constant 0 : index
    %1 = vector.load %arg3[%c0_1, %c0_2] : memref<32x64xf32, #tpu.memory_space<vmem>>, vector<32x64xf32>
    %cst = arith.constant dense<0.000000e+00> : vector<8x64xf32>
    %2 = tpu.matmul %0, %1, %cst {dimension_numbers = #tpu.dot_dimension_numbers<[1], [0], [0], [1], [0, 0, 1, 1], [], []>} : vector<8x32xf32>, vector<32x64xf32>, vector<8x64xf32> -> vector<8x64xf32>
    %c0_3 = arith.constant 0 : index
    %c0_4 = arith.constant 0 : index
    %3 = vector.load %arg4[%c0_3, %c0_4] : memref<1x64xf32, #tpu.memory_space<vmem>>, vector<1x64xf32>
    %4 = vector.broadcast %3 : vector<1x64xf32> to vector<8x64xf32>
    %5 = arith.addf %2, %4 : vector<8x64xf32>
    %cst_5 = arith.constant 5.000000e-01 : f32
    %6 = vector.broadcast %cst_5 : f32 to vector<8x64xf32>
    %7 = arith.mulf %6, %5 : vector<8x64xf32>
    %cst_6 = arith.constant 0.707106769 : f32
    %8 = vector.broadcast %cst_6 : f32 to vector<8x64xf32>
    %9 = arith.mulf %5, %8 : vector<8x64xf32>
    %10 = math.erf %9 : vector<8x64xf32>
    %cst_7 = arith.constant 1.000000e+00 : f32
    %11 = vector.broadcast %cst_7 : f32 to vector<8x64xf32>
    %12 = arith.addf %11, %10 : vector<8x64xf32>
    %13 = arith.mulf %7, %12 : vector<8x64xf32>
    %c0_8 = arith.constant 0 : index
    %c0_9 = arith.constant 0 : index
    %14 = vector.load %arg5[%c0_8, %c0_9] : memref<64x32xf32, #tpu.memory_space<vmem>>, vector<64x32xf32>
    %cst_10 = arith.constant dense<0.000000e+00> : vector<8x32xf32>
    %15 = tpu.matmul %13, %14, %cst_10 {dimension_numbers = #tpu.dot_dimension_numbers<[1], [0], [0], [1], [0, 0, 1, 1], [], []>} : vector<8x64xf32>, vector<64x32xf32>, vector<8x32xf32> -> vector<8x32xf32>
    %c0_11 = arith.constant 0 : index
    %c0_12 = arith.constant 0 : index
    %16 = vector.load %arg6[%c0_11, %c0_12] : memref<1x32xf32, #tpu.memory_space<vmem>>, vector<1x32xf32>
    %17 = vector.broadcast %16 : vector<1x32xf32> to vector<8x32xf32>
    %18 = arith.addf %15, %17 : vector<8x32xf32>
    %c0_13 = arith.constant 0 : index
    %c0_14 = arith.constant 0 : index
    %19 = vector.load %arg7[%c0_13, %c0_14] : memref<8x32xf32, #tpu.memory_space<vmem>>, vector<8x32xf32>
    tpu.vector_store %arg7[%c0_13, %c0_14], %18 {strides = array<i32>} : memref<8x32xf32, #tpu.memory_space<vmem>>, vector<8x32xf32>,
    return
  }
  func.func @transform_0(%arg0: i32, %arg1: i32) -> (i32, i32) {
    %c0_i32 = arith.constant 0 : i32
    %c0_i32_0 = arith.constant 0 : i32
    return %arg0, %c0_i32 : i32, i32
  }
  func.func @transform_1(%arg0: i32, %arg1: i32) -> (i32, i32) {
    %c0_i32 = arith.constant 0 : i32
    %c0_i32_0 = arith.constant 0 : i32
    return %c0_i32, %arg1 : i32, i32
  }
  func.func @transform_2(%arg0: i32, %arg1: i32) -> (i32, i32) {
    %c0_i32 = arith.constant 0 : i32
    %c0_i32_0 = arith.constant 0 : i32
    return %c0_i32, %arg1 : i32, i32
  }
  func.func @transform_3(%arg0: i32, %arg1: i32) -> (i32, i32) {
    %c0_i32 = arith.constant 0 : i32
    %c0_i32_0 = arith.constant 0 : i32
    return %arg1, %c0_i32 : i32, i32
  }
  func.func @transform_4(%arg0: i32, %arg1: i32) -> (i32, i32) {
    %c0_i32 = arith.constant 0 : i32
    %c0_i32_0 = arith.constant 0 : i32
    %c0_i32_1 = arith.constant 0 : i32
    return %c0_i32, %c0_i32_0 : i32, i32
  }
  func.func @transform_5(%arg0: i32, %arg1: i32) -> (i32, i32) {
    %c0_i32 = arith.constant 0 : i32
    %c0_i32_0 = arith.constant 0 : i32
    return %arg0, %c0_i32 : i32, i32
  }
}

</mosaic_0001>

<bundles_post_ra>
// kernel: tpu_custom_call.1
= control target key start
LH: loop header
LB: loop body
LE: loop exit
PB: predicated region body
PF: predicated region fallthrough
CT: control target
= control target key end

     0   :  { %10 = vsyncpa [#allocation3], 0  ;;  %s970_s0 = inlined_call_operand.vmem [shape: f32[16,32], index: 0, kind: input, shape index: {}]   ;;  %s971_s1 = inlined_call_operand.vmem [shape: f32[32,64], index: 1, kind: input, shape index: {}]   ;;  %s972_s2 = inlined_call_operand.vmem [shape: f32[1,64], index: 2, kind: input, shape index: {}]   ;;  %s973_s3 = inlined_call_operand.vmem [shape: f32[64,32], index: 3, kind: input, shape index: {}]   ;;  %s974_s4 = inlined_call_operand.vmem [shape: f32[1,32], index: 4, kind: input, shape index: {}]   ;;  %s975_s5 = inlined_call_operand.hbm [shape: f32[16,32], index: 5, kind: output, shape index: {}]  }
   0x1   :  { %12 = vsyncpa [#allocation3 + $0x1], 0  ;;  %s821_s18 = smov 0   ;;  %s823_s19 = smov 0  }
   0x2   :  { %s825_s20 = smov 0   ;;  %s827_s21 = smov 0  }
   0x3   :  { %s829_s22 = smov 0   ;;  %s831_s23 = smov 0  }
   0x4 LB: > { %s589_s24 = sadd.s32 4294967295, %s786_s23   ;;  %s590_s25 = sadd.s32 4294967294, %s786_s23   ;;  %s786_s23 = sphi %s831_s23, %s18_s23   ;;  %s782_s22 = sphi %s829_s22, %s982_s22   ;;  %s778_s21 = sphi %s827_s21, %s981_s21   ;;  %s774_s20 = sphi %s825_s20, %s980_s20   ;;  %s770_s19 = sphi %s823_s19, %s979_s19   ;;  %s766_s18 = sphi %s821_s18, %s978_s18  }
   0x5   : > { %s30_s26 = sadd.s32 1, %s782_s22  ;;  %s162_s27 = sadd.s32 1, %s774_s20 }
   0x6   : > { %p32_p0 = scmp.ge.s32.totalorder %s30_s26, 2  ;;  %p172_p1 = scmp.ne.s32.totalorder %s774_s20, %s770_s19 }
   0x7   : > { %p173_p2 = scmp.eq.s32.totalorder %s589_s24, 1  ;;  %p178_p3 = scmp.ne.s32.totalorder %s770_s19, %s766_s18 }
   0x8   : > { %s984_s26 = smov (%p32_p0, %s30_s26), 0  ;;  %p179_p5 = scmp.eq.s32.totalorder %s590_s25, 1 }
   0x9   : > { %p861_p4 = por %p173_p2, %p172_p1  ;;  %s159_s29 = ssub.s32 %s782_s22, %s984_s26 }
   0xa   : > { %p596_p6 = scmp.ge.s32.totalorder %s786_s23, 1  ;;  %p160_p7 = scmp.eq.s32.totalorder %s159_s29, 0 }
   0xb   : > { %p868_p8 = por %p179_p5, %p178_p3  ;;  %p229_p9 = scmp.lt.s32.totalorder %s786_s23, 3 }
   0xc   : > { %s874_s6 = scalar_select %p160_p7, %s774_s20, %s162_s27  }
   0xd   : > { %p230_p10 = pnand %p596_p6, %p229_p9 }
   0xe   : > { %p268_p11 = scmp.lt.s32.totalorder (!%p230_p10), %s778_s21, 1  ;;  %s265_s8 = sand.u32 (!%p230_p10), 1, %s770_s19  }
   0xf   : > { %233 = sbr.rel (%p230_p10) target bundleno = 452 (0x1c4), region = 40  ;;  %s597_s9 = sshll.u32 (!%p230_p10), %s265_s8, 3 }
  0x10   : > { %s604_s12 = sshll.u32 (!%p230_p10), %s778_s21, 7  ;;  %s267_s13 = scalar_lea.vmem (!%p230_p10), [#allocation2], %s597_s9 }
  0x11   : > { %s929_s17 = scalar_lea.hbm (!%p230_p10), %s975_s5, %s604_s12  ;;  %s467_s24 = scalar_lea.sflag (!%p230_p10), [#allocation3], %s265_s8 }
  0x14   : > { %v289_v0 = vld [vmem:[%s971_s1 + $0x18] sm:$0xff]  ;;  %v788_v1 = vmov 0.0   ;;  %v288_v2 = vld [vmem:[%s971_s1 + $0x10] sm:$0xff]  ;;  %vm789_vm0 = vmmov 0   ;;  %s269_s11 = scalar_select %p268_p11, %s778_s21, 1  ;;  %v287_v3 = vld [vmem:[%s971_s1 + $0x8] sm:$0xff] }
  0x15   : > { %621 = vmatprep.subr.mxu0 %v788_v1  ;;  %629 = vmatprep.mubr.msk.f32.mxu0 %vm789_vm0, %v788_v1  ;;  %v286_v4 = vld [vmem:[%s971_s1] sm:$0xff]  ;;  %vm297_vm1 = vcmask 261120   ;;  %v383_v6 = vld [vmem:[%s973_s3 + $0x38] sm:$0xff]  ;;  %v382_v7 = vld [vmem:[%s973_s3 + $0x30] sm:$0xff]  ;;  %vm391_vm2 = vcmask 523264   ;;  %s790_s21 = smov [#allocation2]  }
  0x16   : > { %622 = vmatpush3.msra.mxu0 %v289_v0  ;;  %632 = vmatprep.subr.mxu1 %v788_v1  ;;  %s598_s14 = sshll.u32 %s269_s11, 3  ;;  %v381_v8 = vld [vmem:[%s973_s3 + $0x28] sm:$0xff]  ;;  %v380_v9 = vld [vmem:[%s973_s3 + $0x20] sm:$0xff]  ;;  %v379_v10 = vld [vmem:[%s973_s3 + $0x18] sm:$0xff]  ;;  %s714_s27 = sshll.u32 %s790_s21, 4  ;;  %s715_s27 = int_to_ptr.vmem [resolvable:$false] %s714_s27 }
  0x17   : > { %623 = vmatprep.subr.mxu0 %v788_v1  ;;  %648 = vmatprep.mubr.msk.f32.mxu1 %vm789_vm0, %v788_v1  ;;  %s271_s25 = scalar_lea.vmem %s970_s0, %s598_s14  ;;  %v378_v11 = vld [vmem:[%s973_s3 + $0x10] sm:$0xff]  ;;  %v377_v12 = vld [vmem:[%s973_s3 + $0x8] sm:$0xff]  ;;  %v376_v13 = vld [vmem:[%s973_s3] sm:$0xff]  ;;  %s480_s14 = sshll.u32 %s267_s13, 4  ;;  %s481_s14 = int_to_ptr.vmem [resolvable:$true] %s480_s14 }
  0x18   : > { %624 = vmatpush3.msra.mxu0 %v288_v2  ;;  %v285_v5 = vld [vmem:[%s271_s25] sm:$0xff]  ;;  %633 = vmatpush3.msra.mxu1 %v383_v6  ;;  %s710_s25 = scalar_lea.vmem %s481_s14, 128  ;;  %s716_s29 = scalar_lea.vmem %s715_s27, 256 }
  0x19   : > { %625 = vmatprep.subr.mxu0 %v788_v1  ;;  %634 = vmatprep.subr.mxu1 %v788_v1  ;;  %v599_v14 = vld [vmem:[%s972_s2] ss:$0 sm:$0xff]  ;;  %p711_p12 = scmp.ne.s32.totalorder %s481_s14, %s710_s25  ;;  %p717_p1 = scmp.lt.s32.totalorder %s481_s14, %s715_s27 }
  0x1a   : > { %626 = vmatpush3.msra.mxu0 %v287_v3  ;;  %635 = vmatpush3.msra.mxu1 %v382_v7  ;;  %v601_v23 = vld [vmem:[%s974_s4] ss:$0 sm:$0xff]  ;;  %p718_p2 = scmp.lt.s32.totalorder %s716_s29, %s710_s25 }
  0x1b   : > { %627 = vmatprep.subr.mxu0 %v788_v1  ;;  %636 = vmatprep.subr.mxu1 %v788_v1  ;;  %p712_p13 = pnand %p711_p12, %p861_p4 }
  0x1c   : > { %628 = vmatpush3.msra.mxu0 %v286_v4  ;;  %637 = vmatpush3.msra.mxu1 %v381_v8  ;;  %p719_p3 = por %p718_p2, %p717_p1 }
  0x1d   : > { %630 = vmatmul.mubr.msk.f32.vlgmr.msra.gmra.mxu0 %vm297_vm1, %v285_v5  ;;  %638 = vmatprep.subr.mxu1 %v788_v1  ;;  %p713_p0 = pneg %p712_p13 }
  0x1e   : > { %639 = vmatpush3.msra.mxu1 %v380_v9 }
  0x1f   : > { %640 = vmatprep.subr.mxu1 %v788_v1  ;;  %p720_p5 = pnand %p719_p3, %p713_p0 }
  0x20   : > { %641 = vmatpush3.msra.mxu1 %v379_v10 }
  0x21   : > { %642 = vmatprep.subr.mxu1 %v788_v1 }
  0x22   : > { %643 = vmatpush3.msra.mxu1 %v378_v11 }
  0x23   : > { %644 = vmatprep.subr.mxu1 %v788_v1 }
  0x24   : > { %645 = vmatpush3.msra.mxu1 %v377_v12 }
  0x25   : > { %646 = vmatprep.subr.mxu1 %v788_v1 }
  0x26   : > { %647 = vmatpush3.msra.mxu1 %v376_v13 }
  0xdd   : > { %v367_v15 = vpop.f32.mrf.mxu0 }
  0xde   : > { %v368_v16 = vadd.f32 %v599_v14, %v367_v15 }
  0xdf   : > { %v631_v17 = vpop.f32.mrf.mxu0 }
  0xe0   : > { %v372_v18 = vmul.f32 0.70710677, %v368_v16  ;;  %v371_v20 = vmul.f32 0.5, %v368_v16 }
  0xe2   : > { %708 = verf.f32 %v372_v18 }
  0xef   : > { %v709_v19 = vpop.eup %708 }
  0xf0   : > { %v374_v21 = vadd.f32 1.0, %v709_v19 }
  0xf2   : > { %v375_v22 = vmul.f32 %v374_v21, %v371_v20 }
  0xf4   : > { %649 = vmatmul.mubr.msk.f32.vlgmr.msra.gmra.mxu1 %vm391_vm2, %v375_v22 }
 0x1b4   : > { %v461_v24 = vpop.f32.mrf.mxu1 }
 0x1b5   : > { %v462_v25 = vadd.f32 %v601_v23, %v461_v24 }
 0x1b6   : > { %v650_v26 = vpop.f32.mrf.mxu1 }
 0x1b7   : > { %465 = vst.msk [vmem:[%s267_s13] sm:$0xff] %vm297_vm1, %v462_v25 }
 0x1b8   : > { %723 = shalt.err (!%p720_p5)
}
 0x1b9   : > { %s724_s7 = scalar_lea.hbm %s929_s17, 128  ;;  %s728_s10 = scalar_lea.hbm %s975_s5, 256 }
 0x1ba   : > { %p725_p6 = scmp.ne.s32.totalorder %s929_s17, %s724_s7  ;;  %p729_p10 = scmp.lt.s32.totalorder %s929_s17, %s975_s5 }
 0x1bb   : > { %p730_p11 = scmp.lt.s32.totalorder %s728_s10, %s724_s7 }
 0x1bc   : > { %p726_p7 = pnand %p725_p6, %p861_p4 }
 0x1bd   : > { %p731_p12 = por %p730_p11, %p729_p10 }
 0x1be   : > { %p727_p9 = pneg %p726_p7 }
 0x1c0   : > { %p732_p13 = pnand %p731_p12, %p727_p9 }
 0x1c2   : > { %735 = shalt.err (!%p732_p13)
}
 0x1c3   : > { %651 = dma.vmem_to_hbm [thread:$0]  (%p861_p4), %s481_s14, 128, %s929_s17, %s467_s24  }
 0x1c4 PF: > { %p657_p0 = scmp.ge.s32.totalorder %s786_s23, 2  ;;  %s492_s13 = sand.u32 1, %s766_s18  }
 0x1c5   : > { %s493_s15 = scalar_lea.sflag [#allocation3], %s492_s13 }
 0x1c6   : > { %p654_p1 = pnand %p657_p0, %p868_p8 }
 0x1c8   : > { %p655_p2 = pneg %p654_p1 }
 0x1ca   : > { %761 = dma.done.wait (%p655_p2), %s493_s15, 128  }
 0x1cb   : > { %763 = vsyncadd (%p655_p2), %s493_s15, 4294967168  ;;  %s18_s23 = sadd.s32 1, %s786_s23   ;;  %s978_s18 = smov %s770_s19 }
 0x1cc   : > { %p15_p3 = scmp.ge.s32.totalorder %s18_s23, 4   ;;  %s979_s19 = smov %s774_s20 }
 0x1cd   : > { %s980_s20 = smov %s874_s6  ;;  %s981_s21 = smov %s782_s22 }
 0x1ce   : > { %s982_s22 = smov %s984_s26  ;;  %17 = sbr.rel (!%p15_p3) target bundleno = 4 (0x4), region = 84 }
 0x1d3   :  { %498 = vsyncpa [#allocation3], 1 }
 0x1d4   :  { %500 = vsyncpa [#allocation3 + $0x1], 1 }

</bundles_post_ra>
